<compile_context>
chip_gen: v7x
topology: tpu7x:2x2x1
jax: 0.10.0
libtpu: 0.0.40
codegen_flags: <defaults>
</compile_context>

<pallas_src>
import functools

import jax
import jax.numpy as jnp
from jax.experimental import pallas as pl
from jax.experimental.pallas import tpu as pltpu


def _dice_partial_kernel(prob_ref, tgt_ref, acc_ref, *,
                         s_rows, tile_rows, tiles_per_split, no_tail):
    """Accumulate lane-partial sums for one (batch, split) pair.

    prob_ref : (C, TR, 128)     probabilities, native dtype
    tgt_ref  : (TR, 128)        integer labels
    acc_ref  : (3, C, 128) f32  resident output block
               [0]=intersection, [1]=sum(prob), [2]=sum(one-hot)
    """
    sp = pl.program_id(1)
    l = pl.program_id(2)

    @pl.when(l == 0)
    def _init():
        acc_ref[...] = jnp.zeros_like(acc_ref)

    tile = sp * tiles_per_split + l          # intended tile index along S
    row0 = tile * tile_rows                  # first spatial row of this tile

    def accumulate(masked):
        probs = prob_ref[...].astype(jnp.float32)        # (C, TR, 128)
        labels = tgt_ref[...].astype(jnp.int32)          # (TR, 128)
        class_idx = jax.lax.broadcasted_iota(jnp.int32, probs.shape, 0)
        match = labels[None, :, :] == class_idx          # (C, TR, 128) bool
        if masked:
            # Rows at/after s_rows are either the cdiv tail or an overshoot
            # tile of the split axis (clamped DMA): zero their contribution.
            row = jax.lax.broadcasted_iota(jnp.int32, labels.shape, 0)
            valid = (row0 + row) < s_rows                # (TR, 128) bool
            match = jnp.logical_and(match, valid[None, :, :])
            probs = jnp.where(valid[None, :, :], probs, 0.0)
        # Sublane-axis reduce -> (C, 128) lane partials, accumulated in f32.
        acc_ref[0] += jnp.sum(jnp.where(match, probs, 0.0), axis=1)
        acc_ref[1] += jnp.sum(probs, axis=1)
        acc_ref[2] += jnp.sum(match.astype(jnp.float32), axis=1)

    if no_tail:
        accumulate(masked=False)
    else:
        is_tail = (row0 + tile_rows) > s_rows

        @pl.when(jnp.logical_not(is_tail))
        def _fast():
            accumulate(masked=False)

        @pl.when(is_tail)
        def _tail():
            accumulate(masked=True)


def dice_accuracy(output, target, *, epsilon=1e-5, tile_rows=None, n_splits=None):
    """Pallas equivalent of DiceAccuracy.forward (weight=None, generalized=None).

    output: (N, C, D, H, W) probabilities (f32 or bf16)
    target: (N, 1, D, H, W) integer labels in [0, C)
    returns: (dice per class (C,), averaged dice scalar)
    """
    # TODO(synk): `weight` and `generalized_dice_option` branches are not
    # implemented (module defaults are None); only the default path is covered.
    N, C, D, H, W = output.shape
    L = D * H * W

    prob_flat = output.reshape(N, C, L)            # contiguous reshape, free
    tgt_flat = target.reshape(N, L)

    # Keep incoming integer labels as-is; only fall back to int32 when needed.
    if (not jnp.issubdtype(tgt_flat.dtype, jnp.integer)) or tgt_flat.dtype.itemsize > 4:
        tgt_flat = tgt_flat.astype(jnp.int32)

    pad = (-L) % 128
    if pad:
        # One-off pad so the (rows, 128) reshape is legal.  Padded probs are 0
        # and padded labels are -1 (never match a class) -> contribute nothing.
        prob_flat = jnp.pad(prob_flat, ((0, 0), (0, 0), (0, pad)))
        tgt_flat = jnp.pad(tgt_flat.astype(jnp.int32), ((0, 0), (0, pad)),
                           constant_values=-1)
    Lp = L + pad
    S = Lp // 128

    prob4 = prob_flat.reshape(N, C, S, 128)
    tgt4 = tgt_flat.reshape(N, 1, S, 128)

    # Generation-aware VMEM budget (v7x has half the VMEM of v5e/v6e).
    try:
        vmem_cap = int(pltpu.get_tpu_info().vmem_capacity_bytes)
    except Exception:
        vmem_cap = 64 * 1024 * 1024
    vmem_limit = min((vmem_cap * 3) // 4, 96 * 1024 * 1024)

    prob_bytes = prob4.dtype.itemsize
    label_bytes = tgt4.dtype.itemsize
    # Per spatial row (128 lanes): double-buffered prob + label streams plus a
    # generous allowance for the in-kernel f32 / i32 / bool intermediates.
    row_bytes = 128 * (2 * (C * prob_bytes + label_bytes) + 24 * C + 16)
    if tile_rows is None:
        tile_rows = max(8, (vmem_limit // 2) // row_bytes)
    if tile_rows >= S or S <= 8:
        tile_rows = S                                   # full dim -> always legal
    else:
        tile_rows = max(8, (min(tile_rows, S) // 8) * 8)  # sublane-aligned block

    num_tiles = pl.cdiv(S, tile_rows)
    if n_splits is None:
        n_splits = 2 if (N % 2 == 1) else 1   # let dual-TC chips split odd/small N
    tiles_per_split = pl.cdiv(num_tiles, n_splits)
    no_tail = (S % tile_rows == 0) and (n_splits * tiles_per_split == num_tiles)

    last_tile = num_tiles - 1
    if n_splits * tiles_per_split == num_tiles:
        def tile_of(sp, l):
            return sp * tiles_per_split + l
    else:
        # Overshoot iterations of the last split re-read the last valid block
        # (in-bounds DMA) and are fully masked inside the kernel.
        def tile_of(sp, l):
            return jnp.minimum(sp * tiles_per_split + l, last_tile)

    kernel = functools.partial(
        _dice_partial_kernel, s_rows=S, tile_rows=tile_rows,
        tiles_per_split=tiles_per_split, no_tail=no_tail)

    partials = pl.pallas_call(
        kernel,
        out_shape=jax.ShapeDtypeStruct((N, n_splits, 3, C, 128), jnp.float32),
        grid_spec=pltpu.PrefetchScalarGridSpec(
            num_scalar_prefetch=0,
            grid=(N, n_splits, tiles_per_split),
            in_specs=[
                pl.BlockSpec((None, C, tile_rows, 128),
                             lambda n, sp, l: (n, 0, tile_of(sp, l), 0)),
                pl.BlockSpec((None, None, tile_rows, 128),
                             lambda n, sp, l: (n, 0, tile_of(sp, l), 0)),
            ],
            out_specs=pl.BlockSpec((None, None, 3, C, 128),
                                   lambda n, sp, l: (n, sp, 0, 0, 0)),
        ),
        compiler_params=pltpu.CompilerParams(
            dimension_semantics=("parallel", "parallel", "arbitrary"),
            vmem_limit_bytes=int(vmem_limit)),
    )(prob4, tgt4)

    # Tiny epilogue (N * n_splits * 3 * C * 128 floats): fold batch, split and
    # lane partials (also the cross-TensorCore combine), then form dice / mean.
    totals = jnp.sum(partials, axis=(0, 1, 4))          # (3, C)
    inter, osum, tsum = totals[0], totals[1], totals[2]
    dice = 2.0 * inter / jnp.maximum(osum + tsum, epsilon)
    return dice, jnp.mean(dice)


def _reference(output, target, epsilon=1e-5):
    N, C, D, H, W = output.shape
    onehot = jax.nn.one_hot(target[:, 0], C, axis=1, dtype=jnp.float32)  # (N,C,D,H,W)
    out_flat = jnp.transpose(output.astype(jnp.float32), (1, 0, 2, 3, 4)).reshape(C, -1)
    tgt_flat = jnp.transpose(onehot, (1, 0, 2, 3, 4)).reshape(C, -1)
    inter = jnp.sum(out_flat * tgt_flat, axis=-1)
    union = jnp.sum(out_flat, axis=-1) + jnp.sum(tgt_flat, axis=-1)
    dice = 2.0 * inter / jnp.maximum(union, epsilon)
    return dice, jnp.mean(dice)


if __name__ == "__main__":
    key = jax.random.PRNGKey(0)
    k1, k2, k3, k4 = jax.random.split(key, 4)

    # Case 1: small 128-aligned spatial extent; single tile, even N (no split).
    N, C, D, H, W = 2, 4, 8, 8, 8
    logits = jax.random.normal(k1, (N, C, D, H, W), dtype=jnp.float32)
    output = jax.nn.softmax(logits, axis=1)                      # prob-like predictions
    target = jax.random.randint(k2, (N, 1, D, H, W), 0, C, dtype=jnp.int32)

    dice, avg = dice_accuracy(output, target)
    jax.block_until_ready((dice, avg))
    dice_ref, avg_ref = _reference(output, target)
    assert jnp.allclose(dice, dice_ref, atol=1e-5, rtol=1e-5), (dice, dice_ref)
    assert jnp.allclose(avg, avg_ref, atol=1e-5, rtol=1e-5), (avg, avg_ref)

    # Case 2: ragged spatial extent (needs 128-pad), multiple tiles + masked
    # tail, N=1 so the 2-way spatial split path runs, non-power-of-two C.
    N2, C2, D2, H2, W2 = 1, 3, 11, 13, 17          # D*H*W = 2431
    logits2 = jax.random.normal(k3, (N2, C2, D2, H2, W2), dtype=jnp.float32)
    output2 = jax.nn.softmax(logits2, axis=1)
    target2 = jax.random.randint(k4, (N2, 1, D2, H2, W2), 0, C2, dtype=jnp.int32)

    dice2, avg2 = dice_accuracy(output2, target2, tile_rows=8)
    jax.block_until_ready((dice2, avg2))
    dice2_ref, avg2_ref = _reference(output2, target2)
    assert jnp.allclose(dice2, dice2_ref, atol=1e-5, rtol=1e-5), (dice2, dice2_ref)
    assert jnp.allclose(avg2, avg2_ref, atol=1e-5, rtol=1e-5), (avg2, avg2_ref)

    print("KERNEL_OK")
</pallas_src>

<mosaic_0001>
module attributes {stable_mosaic.version = 11 : i64} {
  func.func @_dice_partial_kernel(%arg0: i32, %arg1: i32, %arg2: i32, %arg3: memref<1x4x4x128xf32, #tpu.memory_space<vmem>>, %arg4: memref<1x1x4x128xi32, #tpu.memory_space<vmem>>, %arg5: memref<1x1x3x4x128xf32, #tpu.memory_space<vmem>>) attributes {dimension_semantics = [#tpu.dimension_semantics<parallel>, #tpu.dimension_semantics<parallel>, #tpu.dimension_semantics<arbitrary>], iteration_bounds = array<i64: 2, 1, 1>, scalar_prefetch = 0 : i64, scratch_operands = 0 : i64, tpu.core_type = #tpu.core_type<tc>, window_params = [{transform_indices = @transform_0, window_bounds = array<i64: 1, 4, 4, 128>}, {transform_indices = @transform_1, window_bounds = array<i64: 1, 1, 4, 128>}, {transform_indices = @transform_2, window_bounds = array<i64: 1, 1, 3, 4, 128>}]} {
    %c0_i32 = arith.constant 0 : i32
    %0 = arith.cmpi eq, %arg2, %c0_i32 : i32
    %1 = arith.extui %0 : i1 to i32
    %c0_i32_0 = arith.constant 0 : i32
    %2 = arith.cmpi ne, %1, %c0_i32_0 : i32
    scf.if %2 {
      %cst_39 = arith.constant 0.000000e+00 : f32
      %36 = vector.broadcast %cst_39 : f32 to vector<3x4x128xf32>
      %c0_40 = arith.constant 0 : index
      %c0_41 = arith.constant 0 : index
      %c0_42 = arith.constant 0 : index
      %c0_43 = arith.constant 0 : index
      %c0_44 = arith.constant 0 : index
      %37 = vector.load %arg5[%c0_40, %c0_41, %c0_42, %c0_43, %c0_44] : memref<1x1x3x4x128xf32, #tpu.memory_space<vmem>>, vector<1x1x3x4x128xf32>
      %38 = vector.shape_cast %37 : vector<1x1x3x4x128xf32> to vector<3x4x128xf32>
      %39 = vector.shape_cast %36 : vector<3x4x128xf32> to vector<1x1x3x4x128xf32>
      tpu.vector_store %arg5[%c0_40, %c0_41, %c0_42, %c0_43, %c0_44], %39 {strides = array<i32>} : memref<1x1x3x4x128xf32, #tpu.memory_space<vmem>>, vector<1x1x3x4x128xf32>,
    } else {
    }
    %c0 = arith.constant 0 : index
    %c0_1 = arith.constant 0 : index
    %c0_2 = arith.constant 0 : index
    %c0_3 = arith.constant 0 : index
    %3 = vector.load %arg3[%c0, %c0_1, %c0_2, %c0_3] : memref<1x4x4x128xf32, #tpu.memory_space<vmem>>, vector<1x4x4x128xf32>
    %4 = vector.shape_cast %3 : vector<1x4x4x128xf32> to vector<4x4x128xf32>
    %c0_4 = arith.constant 0 : index
    %c0_5 = arith.constant 0 : index
    %c0_6 = arith.constant 0 : index
    %c0_7 = arith.constant 0 : index
    %5 = vector.load %arg4[%c0_4, %c0_5, %c0_6, %c0_7] : memref<1x1x4x128xi32, #tpu.memory_space<vmem>>, vector<1x1x4x128xi32>
    %6 = vector.shape_cast %5 : vector<1x1x4x128xi32> to vector<4x128xi32>
    %7 = tpu.iota {dimensions = array<i32: 0>} : vector<4x4x128xi32>
    %8 = vector.shape_cast %6 : vector<4x128xi32> to vector<1x4x128xi32>
    %9 = vector.broadcast %8 : vector<1x4x128xi32> to vector<4x4x128xi32>
    %10 = arith.cmpi eq, %9, %7 : vector<4x4x128xi32>
    %c0_8 = arith.constant 0 : index
    %c0_9 = arith.constant 0 : index
    %c0_10 = arith.constant 0 : index
    %c0_11 = arith.constant 0 : index
    %c0_12 = arith.constant 0 : index
    %11 = vector.load %arg5[%c0_8, %c0_9, %c0_10, %c0_11, %c0_12] : memref<1x1x3x4x128xf32, #tpu.memory_space<vmem>>, vector<1x1x1x4x128xf32>
    %12 = vector.shape_cast %11 : vector<1x1x1x4x128xf32> to vector<4x128xf32>
    %cst = arith.constant 0.000000e+00 : f32
    %13 = vector.broadcast %cst : f32 to vector<4x4x128xf32>
    %14 = arith.select %10, %4, %13 : vector<4x4x128xi1>, vector<4x4x128xf32>
    %cst_13 = arith.constant dense<0.000000e+00> : vector<4x128xf32>
    %15 = vector.multi_reduction <add>, %14, %cst_13 [1] : vector<4x4x128xf32> to vector<4x128xf32>
    %16 = arith.addf %12, %15 : vector<4x128xf32>
    %c0_14 = arith.constant 0 : index
    %c0_15 = arith.constant 0 : index
    %c0_16 = arith.constant 0 : index
    %c0_17 = arith.constant 0 : index
    %c0_18 = arith.constant 0 : index
    %17 = vector.load %arg5[%c0_14, %c0_15, %c0_16, %c0_17, %c0_18] : memref<1x1x3x4x128xf32, #tpu.memory_space<vmem>>, vector<1x1x1x4x128xf32>
    %18 = vector.shape_cast %17 : vector<1x1x1x4x128xf32> to vector<4x128xf32>
    %19 = vector.shape_cast %16 : vector<4x128xf32> to vector<1x1x1x4x128xf32>
    tpu.vector_store %arg5[%c0_14, %c0_15, %c0_16, %c0_17, %c0_18], %19 {strides = array<i32>} : memref<1x1x3x4x128xf32, #tpu.memory_space<vmem>>, vector<1x1x1x4x128xf32>,
    %c0_19 = arith.constant 0 : index
    %c0_20 = arith.constant 0 : index
    %c1 = arith.constant 1 : index
    %c0_21 = arith.constant 0 : index
    %c0_22 = arith.constant 0 : index
    %20 = vector.load %arg5[%c0_19, %c0_20, %c1, %c0_21, %c0_22] : memref<1x1x3x4x128xf32, #tpu.memory_space<vmem>>, vector<1x1x1x4x128xf32>
    %21 = vector.shape_cast %20 : vector<1x1x1x4x128xf32> to vector<4x128xf32>
    %cst_23 = arith.constant dense<0.000000e+00> : vector<4x128xf32>
    %22 = vector.multi_reduction <add>, %4, %cst_23 [1] : vector<4x4x128xf32> to vector<4x128xf32>
    %23 = arith.addf %21, %22 : vector<4x128xf32>
    %c0_24 = arith.constant 0 : index
    %c0_25 = arith.constant 0 : index
    %c1_26 = arith.constant 1 : index
    %c0_27 = arith.constant 0 : index
    %c0_28 = arith.constant 0 : index
    %24 = vector.load %arg5[%c0_24, %c0_25, %c1_26, %c0_27, %c0_28] : memref<1x1x3x4x128xf32, #tpu.memory_space<vmem>>, vector<1x1x1x4x128xf32>
    %25 = vector.shape_cast %24 : vector<1x1x1x4x128xf32> to vector<4x128xf32>
    %26 = vector.shape_cast %23 : vector<4x128xf32> to vector<1x1x1x4x128xf32>
    tpu.vector_store %arg5[%c0_24, %c0_25, %c1_26, %c0_27, %c0_28], %26 {strides = array<i32>} : memref<1x1x3x4x128xf32, #tpu.memory_space<vmem>>, vector<1x1x1x4x128xf32>,
    %c0_29 = arith.constant 0 : index
    %c0_30 = arith.constant 0 : index
    %c2 = arith.constant 2 : index
    %c0_31 = arith.constant 0 : index
    %c0_32 = arith.constant 0 : index
    %27 = vector.load %arg5[%c0_29, %c0_30, %c2, %c0_31, %c0_32] : memref<1x1x3x4x128xf32, #tpu.memory_space<vmem>>, vector<1x1x1x4x128xf32>
    %28 = vector.shape_cast %27 : vector<1x1x1x4x128xf32> to vector<4x128xf32>
    %29 = arith.extui %10 : vector<4x4x128xi1> to vector<4x4x128xi32>
    %30 = arith.sitofp %29 : vector<4x4x128xi32> to vector<4x4x128xf32>
    %cst_33 = arith.constant dense<0.000000e+00> : vector<4x128xf32>
    %31 = vector.multi_reduction <add>, %30, %cst_33 [1] : vector<4x4x128xf32> to vector<4x128xf32>
    %32 = arith.addf %28, %31 : vector<4x128xf32>
    %c0_34 = arith.constant 0 : index
    %c0_35 = arith.constant 0 : index
    %c2_36 = arith.constant 2 : index
    %c0_37 = arith.constant 0 : index
    %c0_38 = arith.constant 0 : index
    %33 = vector.load %arg5[%c0_34, %c0_35, %c2_36, %c0_37, %c0_38] : memref<1x1x3x4x128xf32, #tpu.memory_space<vmem>>, vector<1x1x1x4x128xf32>
    %34 = vector.shape_cast %33 : vector<1x1x1x4x128xf32> to vector<4x128xf32>
    %35 = vector.shape_cast %32 : vector<4x128xf32> to vector<1x1x1x4x128xf32>
    tpu.vector_store %arg5[%c0_34, %c0_35, %c2_36, %c0_37, %c0_38], %35 {strides = array<i32>} : memref<1x1x3x4x128xf32, #tpu.memory_space<vmem>>, vector<1x1x1x4x128xf32>,
    return
  }
  func.func @transform_0(%arg0: i32, %arg1: i32, %arg2: i32) -> (i32, i32, i32, i32) {
    %c1_i32 = arith.constant 1 : i32
    %0 = arith.muli %arg1, %c1_i32 : i32
    %1 = arith.addi %0, %arg2 : i32
    %c0_i32 = arith.constant 0 : i32
    %c0_i32_0 = arith.constant 0 : i32
    %c0_i32_1 = arith.constant 0 : i32
    return %arg0, %c0_i32, %1, %c0_i32_0 : i32, i32, i32, i32
  }
  func.func @transform_1(%arg0: i32, %arg1: i32, %arg2: i32) -> (i32, i32, i32, i32) {
    %c1_i32 = arith.constant 1 : i32
    %0 = arith.muli %arg1, %c1_i32 : i32
    %1 = arith.addi %0, %arg2 : i32
    %c0_i32 = arith.constant 0 : i32
    %c0_i32_0 = arith.constant 0 : i32
    %c0_i32_1 = arith.constant 0 : i32
    return %arg0, %c0_i32, %1, %c0_i32_0 : i32, i32, i32, i32
  }
  func.func @transform_2(%arg0: i32, %arg1: i32, %arg2: i32) -> (i32, i32, i32, i32, i32) {
    %c0_i32 = arith.constant 0 : i32
    %c0_i32_0 = arith.constant 0 : i32
    %c0_i32_1 = arith.constant 0 : i32
    %c0_i32_2 = arith.constant 0 : i32
    return %arg0, %arg1, %c0_i32, %c0_i32_0, %c0_i32_1 : i32, i32, i32, i32, i32
  }
}

</mosaic_0001>

<bundles_post_ra>
// kernel: tpu_custom_call.1
= control target key start
LH: loop header
LB: loop body
LE: loop exit
PB: predicated region body
PF: predicated region fallthrough
CT: control target
= control target key end

     0   :  { %7 = vsyncpa [#allocation3], 0  ;;  %s1065_s0 = inlined_call_operand.hbm [shape: f32[2,4,4,128], index: 0, kind: input, shape index: {}]   ;;  %s1066_s1 = inlined_call_operand.hbm [shape: s32[2,1,4,128], index: 1, kind: input, shape index: {}]   ;;  %s1067_s2 = inlined_call_operand.hbm [shape: f32[2,1,3,4,128], index: 2, kind: output, shape index: {}]  }
   0x1   :  { %9 = vsyncpa [#allocation3 + $0x1], 0 }
   0x2   :  { %10 = vsyncpa [#allocation6], 0 }
   0x3   :  { %12 = vsyncpa [#allocation6 + $0x1], 0 }
   0x4   :  { %13 = vsyncpa [#allocation4], 0 }
   0x5   :  { %15 = vsyncpa [#allocation4 + $0x1], 0  ;;  %s785_s9 = smov 0   ;;  %s787_s10 = smov 0  }
   0x6   :  { %s789_s11 = smov 0   ;;  %s791_s12 = smov 0  }
   0x7   :  { %s793_s13 = smov 0   ;;  %s795_s14 = smov 0  }
   0x8 LB: > { %s516_s15 = sadd.s32 4294967295, %s760_s14   ;;  %s517_s16 = sadd.s32 4294967294, %s760_s14   ;;  %s760_s14 = sphi %s795_s14, %s21_s14   ;;  %s756_s13 = sphi %s793_s13, %s1086_s13   ;;  %s752_s12 = sphi %s791_s12, %s1085_s12   ;;  %s748_s11 = sphi %s789_s11, %s1084_s11   ;;  %s744_s10 = sphi %s787_s10, %s1083_s10   ;;  %s740_s9 = sphi %s785_s9, %s1082_s9  }
   0x9   : > { %s40_s17 = sadd.s32 1, %s756_s13  ;;  %s51_s18 = sadd.s32 1, %s748_s11 }
   0xa   : > { %p42_p0 = scmp.ge.s32.totalorder %s40_s17, 2  ;;  %p58_p1 = scmp.ne.s32.totalorder %s748_s11, %s744_s10 }
   0xb   : > { %p59_p2 = scmp.eq.s32.totalorder %s760_s14, 0  ;;  %p64_p3 = scmp.ne.s32.totalorder %s744_s10, %s740_s9 }
   0xc   : > { %s1088_s17 = smov (%p42_p0, %s40_s17), 0  ;;  %p65_p5 = scmp.eq.s32.totalorder %s516_s15, 0 }
   0xd   : > { %p826_p4 = por %p59_p2, %p58_p1  ;;  %s46_s20 = ssub.s32 %s756_s13, %s1088_s17 }
   0xe   : > { %p120_p6 = scmp.eq.s32.totalorder %s516_s15, 1  ;;  %p49_p7 = scmp.eq.s32.totalorder %s46_s20, 0 }
   0xf   : > { %p832_p8 = por %p65_p5, %p64_p3  ;;  %p126_p10 = scmp.eq.s32.totalorder %s517_s16, 1 }
  0x10   : > { %p836_p9 = por %p120_p6, %p58_p1  ;;  %p559_p13 = scmp.lt.s32.totalorder %s760_s14, 2 }
  0x11   : > { %s1071_s21 = scalar_select %p832_p8, 1, 0 }
  0x12   : > { %s1072_s22 = scalar_select %p836_p9, 1, 0 }
  0x13   : > { %s841_s23 = scalar_select %p49_p7, %s748_s11, %s51_s18  }
  0x14   : > { %p843_p11 = por %p126_p10, %p64_p3  ;;  %s850_s25 = sand.u32 1, %s748_s11  }
  0x15   : > { %s520_s26 = sshll.u32 %s850_s25, 4  ;;  %s539_s27 = sshll.u32 %s756_s13, 8 }
  0x16   : > { %s1073_s24 = scalar_select %p843_p11, 1, 0 }
  0x17   : > { %s857_s30 = scalar_lea.hbm %s1065_s0, %s539_s27  ;;  %s150_s3 = scalar_lea.vmem [#allocation2], %s520_s26 }
  0x18   : > { %s159_s4 = sshll.u32 %s150_s3, 4  ;;  %p863_p0 = pnand %p559_p13, %p826_p4  ;;  %s859_s4 = int_to_ptr.vmem [resolvable:$true] %s159_s4 }
  0x19   : > { %s147_s6 = scalar_lea.sflag [#allocation3], %s850_s25  ;;  %s614_s7 = scalar_lea.hbm %s857_s30, 256 }
  0x1a   : > { %p615_p2 = scmp.ne.s32.totalorder %s857_s30, %s614_s7  ;;  %p616_p3 = pneg %p863_p0 }
  0x1b   : > { %s619_s16 = scalar_lea.hbm %s1065_s0, 512  ;;  %p620_p4 = scmp.lt.u32.totalorder %s857_s30, %s1065_s0 }
  0x1c   : > { %p617_p5 = pnand %p616_p3, %p615_p2  ;;  %p621_p7 = scmp.lt.u32.totalorder %s619_s16, %s614_s7 }
  0x1d   : > { %p623_p13 = scmp.lt.u32.totalorder %s614_s7, %s857_s30 }
  0x1e   : > { %p618_p6 = pneg %p617_p5  ;;  %p622_p10 = por %p621_p7, %p620_p4 }
  0x20   : > { %p624_p12 = por %p623_p13, %p622_p10 }
  0x22   : > { %p625_p1 = pnand %p624_p12, %p618_p6 }
  0x24   : > { %628 = shalt.err (!%p625_p1)
}
  0x25   : > { %s629_s20 = scalar_lea.vmem %s859_s4, 256  ;;  %s762_s26 = smov [#allocation2]  }
  0x26   : > { %p630_p2 = scmp.ne.s32.totalorder %s859_s4, %s629_s20  ;;  %s634_s27 = sshll.u32 %s762_s26, 4  ;;  %s635_s27 = int_to_ptr.vmem [resolvable:$false] %s634_s27 }
  0x27   : > { %s636_s28 = scalar_lea.vmem %s635_s27, 512  ;;  %p637_p9 = scmp.lt.s32.totalorder %s859_s4, %s635_s27 }
  0x28   : > { %p632_p5 = pnand %p630_p2, %p616_p3  ;;  %p638_p4 = scmp.lt.s32.totalorder %s636_s28, %s629_s20 }
  0x2a   : > { %p633_p11 = pneg %p632_p5  ;;  %p639_p7 = por %p638_p4, %p637_p9 }
  0x2c   : > { %p640_p10 = pnand %p639_p7, %p633_p11 }
  0x2e   : > { %643 = shalt.err (!%p640_p10)
}
  0x2f   : > { %s763_s29 = smov 64   ;;  %s764_s3 = smov 4  }
  0x30   : > { %551 = dma.hbm_to_vmem [thread:$0]  (!%p863_p0), %s857_s30, 256, %s859_s4, %s147_s6, %s763_s29, %s763_s29, %s764_s3  }
  0x31   : > { %p187_p12 = scmp.lt.s32.totalorder %s760_s14, 3  ;;  %s523_s7 = sshll.u32 %s850_s25, 2 }
  0x32   : > { %s524_s8 = sshll.u32 %s756_s13, 6  ;;  %p1075_p9 = scmp.ge.s32.totalorder %s760_s14, 1 }
  0x33   : > { %s908_s19 = scalar_lea.hbm %s1066_s1, %s524_s8  ;;  %s173_s20 = scalar_lea.vmem [#allocation5], %s523_s7 }
  0x34   : > { %p901_p11 = pnand %p1075_p9, %p187_p12  ;;  %s182_s26 = sshll.u32 %s173_s20, 4  ;;  %s183_s26 = int_to_ptr.vmem [resolvable:$true] %s182_s26 }
  0x35   : > { %s170_s30 = scalar_lea.sflag [#allocation6], %s850_s25  ;;  %s644_s4 = scalar_lea.hbm %s908_s19, 64 }
  0x36   : > { %s1076_s15 = scalar_select %p901_p11, 1, 0 }
  0x37   : > { %p645_p1 = scmp.ne.s32.totalorder %s908_s19, %s644_s4  ;;  %s649_s28 = scalar_lea.hbm %s1066_s1, 128 }
  0x38   : > { %p650_p2 = scmp.lt.u32.totalorder %s908_s19, %s1066_s1  ;;  %p651_p5 = scmp.lt.u32.totalorder %s649_s28, %s644_s4 }
  0x39   : > { %p647_p6 = pnand %p645_p1, %p616_p3  ;;  %p653_p7 = scmp.lt.u32.totalorder %s644_s4, %s908_s19 }
  0x3a   : > { %p652_p4 = por %p651_p5, %p650_p2 }
  0x3b   : > { %p648_p13 = pneg %p647_p6 }
  0x3c   : > { %p654_p10 = por %p653_p7, %p652_p4 }
  0x3e   : > { %p655_p12 = pnand %p654_p10, %p648_p13 }
  0x40   : > { %658 = shalt.err (!%p655_p12)
}
  0x41   : > { %s659_s25 = scalar_lea.vmem %s183_s26, 64  ;;  %s765_s7 = smov [#allocation5]  }
  0x42   : > { %p660_p9 = scmp.ne.s32.totalorder %s183_s26, %s659_s25  ;;  %s664_s8 = sshll.u32 %s765_s7, 4  ;;  %s665_s8 = int_to_ptr.vmem [resolvable:$false] %s664_s8 }
  0x43   : > { %s666_s16 = scalar_lea.vmem %s665_s8, 128  ;;  %p667_p8 = scmp.lt.s32.totalorder %s183_s26, %s665_s8 }
  0x44   : > { %p662_p1 = pnand %p660_p9, %p616_p3  ;;  %p668_p11 = scmp.lt.s32.totalorder %s666_s16, %s659_s25 }
  0x46   : > { %p663_p6 = pneg %p662_p1  ;;  %p669_p2 = por %p668_p11, %p667_p8 }
  0x48   : > { %p670_p5 = pnand %p669_p2, %p663_p6 }
  0x4a   : > { %673 = shalt.err (!%p670_p5)
}
  0x4b   : > { %554 = dma.hbm_to_vmem [thread:$0]  (!%p863_p0), %s908_s19, 64, %s183_s26, %s170_s30  }
  0x4c   : > { %p1077_p13 = scmp.ne.s32.totalorder %s1076_s15, 0 }
  0x4d   : > { %s933_s18 = sand.u32 (!%p1077_p13), 1, %s744_s10   ;;  %p1078_p3 = scmp.ne.s32.totalorder (!%p1077_p13), %s1071_s21, 0 }
  0x4e   : > { %191 = sbr.rel (%p1077_p13) target bundleno = 143 (0x8f), region = 28  ;;  %s526_s20 = sshll.u32 (!%p1077_p13), %s933_s18, 4 }
  0x4f   : > { %s194_s4 = scalar_lea.sflag (!%p1077_p13), [#allocation3], %s933_s18  ;;  %s197_s6 = scalar_lea.vmem (!%p1077_p13), [#allocation2], %s526_s20 }
  0x55   : > { %727 = dma.done.wait (%p1078_p3), %s194_s4, 256  }
  0x56   : > { %729 = vsyncadd (%p1078_p3), %s194_s4, 4294967040  ;;  %s527_s5 = sshll.u32 %s933_s18, 2  ;;  %s203_s15 = scalar_lea.sflag [#allocation6], %s933_s18 }
  0x57   : > { %s206_s19 = scalar_lea.vmem [#allocation5], %s527_s5 }
  0x58   : > { %731 = dma.done.wait (%p1078_p3), %s203_s15, 64  }
  0x59   : > { %733 = vsyncadd (%p1078_p3), %s203_s15, 4294967232  ;;  %s540_s26 = smul.u32 12, %s933_s18  ;;  %v766_v0 = vmov 0.0   ;;  %vm255_vm0 = vcmask 1043456   ;;  %v241_v1 = vld [vmem:[%s197_s6] sm:$0xf] }
  0x5a   : > { %v242_v2 = vld [vmem:[%s197_s6 + $0x4] sm:$0xf]  ;;  %v243_v3 = vld [vmem:[%s197_s6 + $0x8] sm:$0xf]  ;;  %v244_v4 = vld [vmem:[%s197_s6 + $0xc] sm:$0xf] }
  0x5b   : > { %s948_s30 = scalar_lea.vmem [#allocation7], %s540_s26  ;;  %v956_v5 = vld [vmem:[%s206_s19] sm:$0xf]  ;;  %v299_v6 = vsel %vm255_vm0, %v241_v1, 0.0  ;;  %v306_v7 = vsel %vm255_vm0, %v242_v2, 0.0  ;;  %vm288_vm5 = vcmask 1041409  }
  0x5c   : > { %238 = vst [vmem:[%s948_s30] sm:$0xf] %v766_v0  ;;  %239 = vst [vmem:[%s948_s30 + $0x4] sm:$0xf] %v766_v0  ;;  %vm246_vm1 = vcmp.eq.s32.totalorder %v956_v5, 0  ;;  %vm247_vm2 = vcmp.eq.s32.totalorder %v956_v5, 1  ;;  %vm248_vm3 = vcmp.eq.s32.totalorder %v956_v5, 2 }
  0x5d   : > { %240 = vst [vmem:[%s948_s30 + $0x8] sm:$0xf] %v766_v0  ;;  %vm249_vm4 = vcmp.eq.s32.totalorder %v956_v5, 3  ;;  %v251_v8 = vsel %vm246_vm1, %v241_v1, 0.0  ;;  %v252_v9 = vsel %vm247_vm2, %v242_v2, 0.0  ;;  %v253_v10 = vsel %vm248_vm3, %v243_v3, 0.0 }
  0x5e   : > { %v254_v11 = vsel %vm249_vm4, %v244_v4, 0.0  ;;  %v256_v12 = vsel %vm255_vm0, %v251_v8, 0.0  ;;  %v263_v13 = vsel %vm255_vm0, %v252_v9, 0.0  ;;  %v270_v14 = vsel %vm255_vm0, %v253_v10, 0.0  ;;  %s541_s21 = smul.u32 192, %s752_s12  ;;  %s401_s27 = sshll.u32 %s948_s30, 4  ;;  %s1015_s27 = int_to_ptr.vmem [resolvable:$true] %s401_s27 }
  0x5f   : > { %v277_v15 = vsel %vm255_vm0, %v254_v11, 0.0  ;;  %v257_v16 = vrot.slane %v256_v12, 4  ;;  %v264_v17 = vrot.slane %v263_v13, 4  ;;  %v271_v18 = vrot.slane %v270_v14, 4  ;;  %s386_s12 = scalar_lea.sflag [#allocation4], %s933_s18  ;;  %s674_s25 = scalar_lea.vmem %s1015_s27, 192 }
  0x60   : > { %v278_v19 = vrot.slane %v277_v15, 4  ;;  %v300_v20 = vrot.slane %v299_v6, 4  ;;  %v307_v21 = vrot.slane %v306_v7, 4  ;;  %v313_v22 = vsel %vm255_vm0, %v243_v3, 0.0  ;;  %s1013_s3 = scalar_lea.hbm %s1067_s2, %s541_s21  ;;  %p675_p8 = scmp.ne.s32.totalorder %s1015_s27, %s674_s25 }
  0x61   : > { %v320_v23 = vsel %vm255_vm0, %v244_v4, 0.0  ;;  %v258_v24 = vadd.f32 %v257_v16, %v256_v12  ;;  %v265_v25 = vadd.f32 %v264_v17, %v263_v13  ;;  %v272_v26 = vadd.f32 %v271_v18, %v270_v14  ;;  %p1079_p0 = scmp.ne.s32.totalorder %s1072_s22, 0  ;;  %s767_s7 = smov [#allocation7]  }
  0x62   : > { %v279_v27 = vadd.f32 %v278_v19, %v277_v15  ;;  %vm290_vm6 = vcmask 1042434   ;;  %vm292_vm7 = vcmask 1043459   ;;  %v301_v28 = vadd.f32 %v300_v20, %v299_v6  ;;  %s678_s8 = sshll.u32 %s767_s7, 4  ;;  %s679_s8 = int_to_ptr.vmem [resolvable:$false] %s678_s8 }
  0x63   : > { %v308_v29 = vadd.f32 %v307_v21, %v306_v7  ;;  %v314_v30 = vrot.slane %v313_v22, 4  ;;  %v321_v31 = vrot.slane %v320_v23, 4  ;;  %v259_v32 = vrot.slane %v258_v24, 2  ;;  %v250_v1 = vld [vmem:[%s948_s30] sm:$0xf]  ;;  %p676_p11 = pnand %p675_p8, %p1079_p0  ;;  %s680_s16 = scalar_lea.vmem %s679_s8, 384 }
  0x64   : > { %v266_v33 = vrot.slane %v265_v25, 2  ;;  %v273_v34 = vrot.slane %v272_v26, 2  ;;  %v280_v35 = vrot.slane %v279_v27, 2  ;;  %v302_v36 = vrot.slane %v301_v28, 2  ;;  %v528_v12 = vld [vmem:[%s948_s30 + $0x4] sm:$0xf]  ;;  %p681_p7 = scmp.lt.s32.totalorder %s1015_s27, %s679_s8  ;;  %p682_p10 = scmp.lt.s32.totalorder %s680_s16, %s674_s25 }
  0x65   : > { %v309_v37 = vrot.slane %v308_v29, 2  ;;  %v315_v38 = vadd.f32 %v314_v30, %v313_v22  ;;  %v322_v39 = vadd.f32 %v321_v31, %v320_v23  ;;  %v260_v40 = vadd.f32 %v259_v32, %v258_v24  ;;  %p677_p4 = pneg %p676_p11 }
  0x66   : > { %v267_v41 = vadd.f32 %v266_v33, %v265_v25  ;;  %v274_v42 = vadd.f32 %v273_v34, %v272_v26  ;;  %v281_v43 = vadd.f32 %v280_v35, %v279_v27  ;;  %v303_v44 = vadd.f32 %v302_v36, %v301_v28  ;;  %p683_p12 = por %p682_p10, %p681_p7 }
  0x67   : > { %v310_v45 = vadd.f32 %v309_v37, %v308_v29  ;;  %v316_v46 = vrot.slane %v315_v38, 2  ;;  %v323_v47 = vrot.slane %v322_v39, 2  ;;  %v261_v48 = vrot.slane %v260_v40, 1 }
  0x68   : > { %v268_v49 = vrot.slane %v267_v41, 1  ;;  %v275_v50 = vrot.slane %v274_v42, 1  ;;  %v282_v51 = vrot.slane %v281_v43, 1  ;;  %v304_v52 = vrot.slane %v303_v44, 1  ;;  %p684_p9 = pnand %p683_p12, %p677_p4 }
  0x69   : > { %v311_v53 = vrot.slane %v310_v45, 1  ;;  %v317_v54 = vadd.f32 %v316_v46, %v315_v38  ;;  %v324_v55 = vadd.f32 %v323_v47, %v322_v39  ;;  %v262_v56 = vadd.f32 %v261_v48, %v260_v40 }
  0x6a   : > { %v269_v57 = vadd.f32 %v268_v49, %v267_v41  ;;  %v276_v58 = vadd.f32 %v275_v50, %v274_v42  ;;  %v283_v59 = vadd.f32 %v282_v51, %v281_v43  ;;  %v305_v60 = vadd.f32 %v304_v52, %v303_v44  ;;  %v530_v44 = vld [vmem:[%s948_s30 + $0x8] sm:$0xf] }
  0x6b   : > { %v312_v61 = vadd.f32 %v311_v53, %v310_v45  ;;  %v318_v62 = vrot.slane %v317_v54, 1  ;;  %v325_v63 = vrot.slane %v324_v55, 1  ;;  %v531_v3 = vsel %vm246_vm1, 1.0, %v766_v0 }
  0x6c   : > { %v289_v2 = vsel %vm288_vm5, %v269_v57, %v262_v56  ;;  %v532_v4 = vsel %vm247_vm2, 1.0, %v766_v0  ;;  %v533_v6 = vsel %vm248_vm3, 1.0, %v766_v0  ;;  %v534_v13 = vsel %vm249_vm4, 1.0, %v766_v0 }
  0x6d   : > { %v291_v7 = vsel %vm290_vm6, %v276_v58, %v289_v2  ;;  %v319_v8 = vadd.f32 %v318_v62, %v317_v54  ;;  %v326_v9 = vadd.f32 %v325_v63, %v324_v55  ;;  %v331_v10 = vsel %vm288_vm5, %v312_v61, %v305_v60 }
  0x6e   : > { %v293_v11 = vsel %vm292_vm7, %v283_v59, %v291_v7  ;;  %v347_v14 = vsel %vm255_vm0, %v531_v3, 0.0  ;;  %v354_v15 = vsel %vm255_vm0, %v532_v4, 0.0  ;;  %v361_v21 = vsel %vm255_vm0, %v533_v6, 0.0 }
  0x6f   : > { %v295_v16 = vadd.f32 %v293_v11, %v250_v1  ;;  %v332_v17 = vsel %vm290_vm6, %v319_v8, %v331_v10  ;;  %v348_v18 = vrot.slane %v347_v14, 4  ;;  %v355_v19 = vrot.slane %v354_v15, 4 }
  0x70   : > { %v333_v20 = vsel %vm292_vm7, %v326_v9, %v332_v17  ;;  %v368_v22 = vsel %vm255_vm0, %v534_v13, 0.0  ;;  %v362_v24 = vrot.slane %v361_v21, 4 }
  0x71   : > { %296 = vst [vmem:[%s948_s30] sm:$0xf] %v295_v16  ;;  %v335_v23 = vadd.f32 %v528_v12, %v333_v20  ;;  %v349_v5 = vadd.f32 %v348_v18, %v347_v14  ;;  %v356_v0 = vadd.f32 %v355_v19, %v354_v15  ;;  %v369_v25 = vrot.slane %v368_v22, 4 }
  0x72   : > { %v363_v28 = vadd.f32 %v362_v24, %v361_v21 }
  0x73   : > { %529 = vst [vmem:[%s948_s30 + $0x4] sm:$0xf] %v335_v23  ;;  %v350_v26 = vrot.slane %v349_v5, 2  ;;  %v357_v27 = vrot.slane %v356_v0, 2  ;;  %v370_v29 = vadd.f32 %v369_v25, %v368_v22 }
  0x74   : > { %v364_v32 = vrot.slane %v363_v28, 2 }
  0x75   : > { %v351_v30 = vadd.f32 %v350_v26, %v349_v5  ;;  %v358_v31 = vadd.f32 %v357_v27, %v356_v0  ;;  %v371_v33 = vrot.slane %v370_v29, 2 }
  0x76   : > { %v365_v36 = vadd.f32 %v364_v32, %v363_v28 }
  0x77   : > { %v352_v34 = vrot.slane %v351_v30, 1  ;;  %v359_v35 = vrot.slane %v358_v31, 1  ;;  %v372_v37 = vadd.f32 %v371_v33, %v370_v29 }
  0x78   : > { %v366_v40 = vrot.slane %v365_v36, 1 }
  0x79   : > { %v353_v38 = vadd.f32 %v352_v34, %v351_v30  ;;  %v360_v39 = vadd.f32 %v359_v35, %v358_v31  ;;  %v373_v41 = vrot.slane %v372_v37, 1 }
  0x7a   : > { %v367_v42 = vadd.f32 %v366_v40, %v365_v36 }
  0x7b   : > { %v379_v43 = vsel %vm288_vm5, %v360_v39, %v353_v38  ;;  %v374_v45 = vadd.f32 %v373_v41, %v372_v37 }
  0x7c   : > { %v380_v46 = vsel %vm290_vm6, %v367_v42, %v379_v43 }
  0x7d   : > { %v381_v47 = vsel %vm292_vm7, %v374_v45, %v380_v46 }
  0x7e   : > { %v383_v48 = vadd.f32 %v530_v44, %v381_v47 }
  0x80   : > { %535 = vst [vmem:[%s948_s30 + $0x8] sm:$0xf] %v383_v48 }
  0x81   : > { %687 = shalt.err (!%p684_p9)
}
  0x82   : > { %s688_s20 = scalar_lea.hbm %s1013_s3, 192  ;;  %s692_s5 = scalar_lea.hbm %s1067_s2, 384 }
  0x83   : > { %p689_p1 = scmp.ne.s32.totalorder %s1013_s3, %s688_s20  ;;  %p693_p5 = scmp.lt.u32.totalorder %s1013_s3, %s1067_s2 }
  0x84   : > { %p694_p13 = scmp.lt.u32.totalorder %s692_s5, %s688_s20  ;;  %p696_p8 = scmp.lt.u32.totalorder %s688_s20, %s1013_s3 }
  0x85   : > { %p690_p6 = pnand %p689_p1, %p1079_p0 }
  0x86   : > { %p695_p3 = por %p694_p13, %p693_p5 }
  0x87   : > { %p691_p2 = pneg %p690_p6 }
  0x88   : > { %p697_p11 = por %p696_p8, %p695_p3 }
  0x8a   : > { %p698_p4 = pnand %p697_p11, %p691_p2 }
  0x8c   : > { %701 = shalt.err (!%p698_p4)
}
  0x8d   : > { %s768_s26 = smov 64   ;;  %s769_s30 = smov 4  }
  0x8e   : > { %546 = dma.vmem_to_hbm [thread:$0]  (%p1079_p0), %s1015_s27, 192, %s1013_s3, %s386_s12, %s768_s26, %s768_s26, %s769_s30  }
  0x8f PF: > { %s416_s21 = sand.u32 1, %s740_s9   ;;  %p1080_p7 = scmp.ne.s32.totalorder %s1073_s24, 0 }
  0x90   : > { %p1081_p10 = scmp.ge.s32.totalorder %s760_s14, 2  ;;  %s417_s28 = scalar_lea.sflag [#allocation4], %s416_s21 }
  0x92   : > { %p556_p12 = pnand %p1081_p10, %p1080_p7 }
  0x94   : > { %735 = dma.done.wait (!%p556_p12), %s417_s28, 192  }
  0x95   : > { %737 = vsyncadd (!%p556_p12), %s417_s28, 4294967104  ;;  %s21_s14 = sadd.s32 1, %s760_s14   ;;  %s1082_s9 = smov %s744_s10 }
  0x96   : > { %p18_p9 = scmp.ge.s32.totalorder %s21_s14, 4   ;;  %s1083_s10 = smov %s748_s11 }
  0x97   : > { %s1084_s11 = smov %s841_s23  ;;  %s1085_s12 = smov %s756_s13 }
  0x98   : > { %s1086_s13 = smov %s1088_s17  ;;  %20 = sbr.rel (!%p18_p9) target bundleno = 8 (0x8), region = 92 }
  0x9f   :  { %422 = vsyncpa [#allocation3], 1 }
  0xa0   :  { %424 = vsyncpa [#allocation3 + $0x1], 1 }
  0xa1   :  { %425 = vsyncpa [#allocation6], 1 }
  0xa2   :  { %427 = vsyncpa [#allocation6 + $0x1], 1 }
  0xa3   :  { %428 = vsyncpa [#allocation4], 1 }
  0xa4   :  { %430 = vsyncpa [#allocation4 + $0x1], 1 }

</bundles_post_ra>
